<compile_context>
chip_gen: v6e
topology: v6e:2x2x1
jax: 0.10.0
libtpu: 0.0.40
codegen_flags: <defaults>
</compile_context>

<pallas_src>
import jax
import jax.numpy as jnp
from jax import lax
from jax.experimental import pallas as pl
from jax.experimental.pallas import tpu as pltpu


# -----------------------------------------------------------------------------
# Fused im2col-GEMM + ReLU kernel
# -----------------------------------------------------------------------------
def _conv_relu_kernel(p_ref, w_ref, o_ref):
    # p_ref: (TM, K) bf16 im2col patches for one batch element
    # w_ref: (K, Cout) bf16 reshaped conv weight (VMEM-resident across grid)
    # o_ref: (TM, Cout) f32 output tile
    acc = jnp.dot(p_ref[...], w_ref[...], preferred_element_type=jnp.float32)
    o_ref[...] = jnp.maximum(acc, 0.0)


def conv_relu_block(x_nchw, w_oihw):
    """ReLU(Conv2d(x, w, stride=1, padding=k//2, bias=None)) in NCHW layout.

    x_nchw: (N, Cin, H, W) float32
    w_oihw: (Cout, Cin, KH, KW) float32   (PyTorch Conv2d weight layout)
    returns (N, Cout, H, W) float32
    """
    n, cin, h, w = x_nchw.shape
    cout, _, kh, kw = w_oihw.shape
    pad = kh // 2
    ho, wo = h, w                                      # stride 1, "same" padding

    # NHWC + spatial zero-pad (layout plumbing outside the kernel).
    x = jnp.transpose(x_nchw, (0, 2, 3, 1)).astype(jnp.float32)
    xp = jnp.pad(x, ((0, 0), (pad, pad), (pad, pad), (0, 0)))

    # im2col in the wrapper: lane-dense (M, K) operand, K = KH*KW*Cin = 576.
    taps = [xp[:, i:i + ho, j:j + wo, :] for i in range(kh) for j in range(kw)]
    patches = jnp.concatenate(taps, axis=-1)           # (N, Ho, Wo, KH*KW*Cin)
    k_dim = kh * kw * cin
    patches = patches.reshape(n * ho * wo, k_dim).astype(jnp.bfloat16)

    # Weight: (Cout, Cin, KH, KW) -> (KH, KW, Cin, Cout) -> (K, Cout); matches
    # the (kh, kw, cin) ordering of the patch concatenation above.
    wmat = jnp.transpose(w_oihw, (2, 3, 1, 0)).reshape(k_dim, cout)
    wmat = wmat.astype(jnp.bfloat16)

    tm = ho * wo                                       # 256 output rows per step
    out = pl.pallas_call(
        _conv_relu_kernel,
        out_shape=jax.ShapeDtypeStruct((n * ho * wo, cout), jnp.float32),
        grid_spec=pltpu.PrefetchScalarGridSpec(
            num_scalar_prefetch=0,
            grid=(n,),
            in_specs=[
                pl.BlockSpec((tm, k_dim), lambda i: (i, 0)),
                pl.BlockSpec((k_dim, cout), lambda i: (0, 0)),
            ],
            out_specs=pl.BlockSpec((tm, cout), lambda i: (i, 0)),
        ),
        compiler_params=pltpu.CompilerParams(
            dimension_semantics=("parallel",)),        # v7x: shard batch over 2 TCs
    )(patches, wmat)

    out = out.reshape(n, ho, wo, cout)
    return jnp.transpose(out, (0, 3, 1, 2))            # back to NCHW


# -----------------------------------------------------------------------------
# Pure-JAX reference (for correctness check only)
# -----------------------------------------------------------------------------
def _ref_conv_relu(x_nchw, w_oihw):
    y = lax.conv_general_dilated(
        x_nchw, w_oihw, window_strides=(1, 1), padding=((1, 1), (1, 1)),
        dimension_numbers=("NCHW", "OIHW", "NCHW"))
    return jnp.maximum(y, 0.0)


if __name__ == "__main__":
    key = jax.random.PRNGKey(0)
    kx, kw_ = jax.random.split(key)
    N, C, H, W = 2, 64, 16, 16                          # Conv_ReLU_Block: Cin=Cout=64
    x = jax.random.normal(kx, (N, C, H, W), jnp.float32)
    wt = jax.random.normal(kw_, (64, 64, 3, 3), jnp.float32) / jnp.sqrt(64.0 * 9.0)

    out = jax.block_until_ready(conv_relu_block(x, wt))
    assert out.shape == (N, 64, H, W), out.shape
    assert bool(jnp.all(jnp.isfinite(out)))

    # Loose tolerance: operands are rounded to bf16 inside the Pallas path.
    ref = _ref_conv_relu(x, wt)
    assert bool(jnp.allclose(out, ref, rtol=5e-2, atol=2e-1)), \
        float(jnp.max(jnp.abs(out - ref)))
    print("KERNEL_OK")
</pallas_src>

<mosaic_0001>
module attributes {stable_mosaic.version = 11 : i64} {
  func.func @_conv_relu_kernel(%arg0: i32, %arg1: memref<256x576xbf16, #tpu.memory_space<vmem>>, %arg2: memref<576x64xbf16, #tpu.memory_space<vmem>>, %arg3: memref<256x64xf32, #tpu.memory_space<vmem>>) attributes {dimension_semantics = [#tpu.dimension_semantics<parallel>], iteration_bounds = array<i64: 2>, scalar_prefetch = 0 : i64, scratch_operands = 0 : i64, tpu.core_type = #tpu.core_type<tc>, window_params = [{transform_indices = @transform_0, window_bounds = array<i64: 256, 576>}, {pipeline_mode = #tpu.pipeline_mode<synchronous>, transform_indices = @transform_1, window_bounds = array<i64: 576, 64>}, {transform_indices = @transform_2, window_bounds = array<i64: 256, 64>}]} {
    %c0 = arith.constant 0 : index
    %c0_0 = arith.constant 0 : index
    %0 = vector.load %arg1[%c0, %c0_0] : memref<256x576xbf16, #tpu.memory_space<vmem>>, vector<256x576xbf16>
    %c0_1 = arith.constant 0 : index
    %c0_2 = arith.constant 0 : index
    %1 = vector.load %arg2[%c0_1, %c0_2] : memref<576x64xbf16, #tpu.memory_space<vmem>>, vector<576x64xbf16>
    %cst = arith.constant dense<0.000000e+00> : vector<256x64xf32>
    %2 = tpu.matmul %0, %1, %cst {dimension_numbers = #tpu.dot_dimension_numbers<[1], [0], [0], [1], [0, 0, 1, 1], [], []>} : vector<256x576xbf16>, vector<576x64xbf16>, vector<256x64xf32> -> vector<256x64xf32>
    %cst_3 = arith.constant 0.000000e+00 : f32
    %3 = vector.broadcast %cst_3 : f32 to vector<256x64xf32>
    %4 = arith.maximumf %2, %3 : vector<256x64xf32>
    %c0_4 = arith.constant 0 : index
    %c0_5 = arith.constant 0 : index
    %5 = vector.load %arg3[%c0_4, %c0_5] : memref<256x64xf32, #tpu.memory_space<vmem>>, vector<256x64xf32>
    tpu.vector_store %arg3[%c0_4, %c0_5], %4 {strides = array<i32>} : memref<256x64xf32, #tpu.memory_space<vmem>>, vector<256x64xf32>,
    return
  }
  func.func @transform_0(%arg0: i32) -> (i32, i32) {
    %c0_i32 = arith.constant 0 : i32
    %c0_i32_0 = arith.constant 0 : i32
    return %arg0, %c0_i32 : i32, i32
  }
  func.func @transform_1(%arg0: i32) -> (i32, i32) {
    %c0_i32 = arith.constant 0 : i32
    %c0_i32_0 = arith.constant 0 : i32
    %c0_i32_1 = arith.constant 0 : i32
    return %c0_i32, %c0_i32_0 : i32, i32
  }
  func.func @transform_2(%arg0: i32) -> (i32, i32) {
    %c0_i32 = arith.constant 0 : i32
    %c0_i32_0 = arith.constant 0 : i32
    return %arg0, %c0_i32 : i32, i32
  }
}

</mosaic_0001>

<bundles_post_ra>
// kernel: tpu_custom_call.1
= control target key start
LH: loop header
LB: loop body
LE: loop exit
PB: predicated region body
PF: predicated region fallthrough
CT: control target
= control target key end

     0   :  { %s2210_s9 = smov 0   ;;  %s2728_s0 = inlined_call_operand.vmem [shape: bf16[512,576], index: 0, kind: input, shape index: {}]   ;;  %s2729_s1 = inlined_call_operand.vmem [shape: bf16[576,64], index: 1, kind: input, shape index: {}]   ;;  %s2730_s2 = inlined_call_operand.vmem [shape: f32[512,64], index: 2, kind: output, shape index: {}]  }
   0x1 LB: > { %s1587_s10 = sadd.s32 4294967295, %s2193_s9   ;;  %p1591_p0 = scmp.ge.s32.totalorder %s2193_s9, 1  ;;  %s2193_s9 = sphi %s2210_s9, %s12_s9  }
   0x2   : > { %p114_p1 = scmp.lt.s32.totalorder %s2193_s9, 3 }
   0x4   : > { %p115_p2 = pnand %p1591_p0, %p114_p1 }
   0x6   : > { %118 = sbr.rel (%p115_p2) target bundleno = 404 (0x194), region = 28 }
   0xb   : > { %v2039_v0 = vld [vmem:[%s2729_s1 + $0x78] sm:$0xff]   ;;  %s1592_s13 = sshll.u32 %s1587_s10, 5  ;;  %v2041_v2 = vld [vmem:[%s2729_s1 + $0x70] sm:$0xff]   ;;  %v2043_v4 = vld [vmem:[%s2729_s1 + $0x68] sm:$0xff]   ;;  %vm935_vm0 = vcmask 523264  }
   0xc   : > { %v2040_v1 = vld [vmem:[%s2729_s1 + $0x38] sm:$0xff]   ;;  %1730 = vmatprep.subr.bf16.mxu0 %v2039_v0  ;;  %2014 = vmatprep.subr.bf16.mxu1 %v2039_v0  ;;  %p138_p3 = scmp.lt.s32.totalorder %s1592_s13, 63  ;;  %v2042_v3 = vld [vmem:[%s2729_s1 + $0x30] sm:$0xff]   ;;  %v2044_v5 = vld [vmem:[%s2729_s1 + $0x28] sm:$0xff]  }
   0xd   : > { %1731 = vmatpush3.bf16.msra.mxu0 %v2040_v1  ;;  %2022 = vmatpush3.bf16.msra.mxu1 %v2040_v1  ;;  %v2045_v6 = vld [vmem:[%s2729_s1 + $0x60] sm:$0xff]   ;;  %v2047_v8 = vld [vmem:[%s2729_s1 + $0x58] sm:$0xff]   ;;  %v2049_v10 = vld [vmem:[%s2729_s1 + $0x50] sm:$0xff]  }
   0xe   : > { %1732 = vmatprep.subr.bf16.mxu0 %v2041_v2  ;;  %2015 = vmatprep.subr.bf16.mxu1 %v2041_v2  ;;  %s2768_s13 = smov (!%p138_p3, %s1592_s13), 63  ;;  %v2046_v7 = vld [vmem:[%s2729_s1 + $0x20] sm:$0xff]   ;;  %v2048_v9 = vld [vmem:[%s2729_s1 + $0x18] sm:$0xff]   ;;  %v2050_v13 = vld [vmem:[%s2729_s1 + $0x10] sm:$0xff]  }
   0xf   : > { %s2030_s26 = smul.u32 20, %s2768_s13  ;;  %v2051_v14 = vld [vmem:[%s2729_s1 + $0x48] sm:$0xff]   ;;  %v2053_v16 = vld [vmem:[%s2729_s1 + $0x40] sm:$0xff]   ;;  %v2061_v18 = vld [vmem:[%s2729_s1 + $0xf8] sm:$0xff]  }
  0x10   : > { %v2052_v15 = vld [vmem:[%s2729_s1 + $0x8] sm:$0xff]   ;;  %v2054_v17 = vld [vmem:[%s2729_s1] sm:$0xff]   ;;  %v2064_v19 = vld [vmem:[%s2729_s1 + $0x118] sm:$0xff]  }
  0x11   : > { %1733 = vmatpush3.bf16.msra.mxu0 %v2042_v3  ;;  %2023 = vmatpush3.bf16.msra.mxu1 %v2042_v3  ;;  %s2251_s5 = scalar_lea.vmem %s2728_s0, %s2030_s26  ;;  %v2062_v22 = vld [vmem:[%s2729_s1 + $0xb8] sm:$0xff]   ;;  %v2063_v23 = vld [vmem:[%s2729_s1 + $0xf0] sm:$0xff]   ;;  %v2072_v28 = vld [vmem:[%s2729_s1 + $0xe8] sm:$0xff]  }
  0x12   : > { %1734 = vmatprep.subr.bf16.mxu0 %v2043_v4  ;;  %2016 = vmatprep.subr.bf16.mxu1 %v2043_v4  ;;  %v2057_v11 = vld [vmem:[%s2251_s5 + $0x4] ss:$20 sps:$4 sm:$0xff]   ;;  %v2055_v20 = vld [vmem:[%s2251_s5] ss:$20 sps:$4 sm:$0xff]   ;;  %v2070_v27 = vld [vmem:[%s2251_s5 + $0x28] ss:$20 sps:$4 sm:$0xff]  }
  0x13   : > { %v2060_v12 = vld [vmem:[%s2251_s5 + $0x1e4] ss:$20 sps:$4 sm:$0xff]   ;;  %1016 = vmatprep.mubr.bf16.mxu0 %v2057_v11  ;;  %v2058_v21 = vld [vmem:[%s2251_s5 + $0x1e0] ss:$20 sps:$4 sm:$0xff]   ;;  %v2071_v29 = vld [vmem:[%s2251_s5 + $0x208] ss:$20 sps:$4 sm:$0xff]  }
  0x14   : > { %1112 = vmatprep.mubr.bf16.mxu1 %v2060_v12  ;;  %v2066_v24 = vld [vmem:[%s2251_s5 + $0x2c] ss:$20 sps:$4 sm:$0xff]   ;;  %v2065_v26 = vld [vmem:[%s2729_s1 + $0xb0] sm:$0xff]   ;;  %v2082_v37 = vld [vmem:[%s2729_s1 + $0xd8] sm:$0xff]  }
  0x15   : > { %1735 = vmatpush3.bf16.msra.mxu0 %v2044_v5  ;;  %2024 = vmatpush3.bf16.msra.mxu1 %v2044_v5  ;;  %v2068_v25 = vld [vmem:[%s2251_s5 + $0x20c] ss:$20 sps:$4 sm:$0xff]   ;;  %v2076_v32 = vld [vmem:[%s2251_s5 + $0x54] ss:$20 sps:$4 sm:$0xff]   ;;  %v2080_v36 = vld [vmem:[%s2251_s5 + $0x50] ss:$20 sps:$4 sm:$0xff]  }
  0x16   : > { %1736 = vmatprep.subr.bf16.mxu0 %v2045_v6  ;;  %2017 = vmatprep.subr.bf16.mxu1 %v2045_v6  ;;  %v2073_v30 = vld [vmem:[%s2729_s1 + $0xa8] sm:$0xff]   ;;  %v2074_v31 = vld [vmem:[%s2729_s1 + $0xe0] sm:$0xff]   ;;  %v2095_v35 = vld [vmem:[%s2729_s1 + $0x110] sm:$0xff]  }
  0x17   : > { %v2078_v33 = vld [vmem:[%s2251_s5 + $0x234] ss:$20 sps:$4 sm:$0xff]   ;;  %v2075_v34 = vld [vmem:[%s2729_s1 + $0xa0] sm:$0xff]   ;;  %v2083_v39 = vld [vmem:[%s2729_s1 + $0x98] sm:$0xff]  }
  0x18   : > { %v2081_v38 = vld [vmem:[%s2251_s5 + $0x230] ss:$20 sps:$4 sm:$0xff]   ;;  %v2090_v44 = vld [vmem:[%s2251_s5 + $0x78] ss:$20 sps:$4 sm:$0xff]   ;;  %v2099_v53 = vld [vmem:[%s2251_s5 + $0x8] ss:$20 sps:$4 sm:$0xff]  }
  0x19   : > { %1737 = vmatpush3.bf16.msra.mxu0 %v2046_v7  ;;  %2025 = vmatpush3.bf16.msra.mxu1 %v2046_v7  ;;  %v2084_v40 = vld [vmem:[%s2729_s1 + $0xd0] sm:$0xff]   ;;  %v2091_v45 = vld [vmem:[%s2251_s5 + $0x258] ss:$20 sps:$4 sm:$0xff]   ;;  %v2094_v49 = vld [vmem:[%s2729_s1 + $0xc0] sm:$0xff]  }
  0x1a   : > { %1738 = vmatprep.subr.bf16.mxu0 %v2047_v8  ;;  %2018 = vmatprep.subr.bf16.mxu1 %v2047_v8  ;;  %v2086_v41 = vld [vmem:[%s2251_s5 + $0x7c] ss:$20 sps:$4 sm:$0xff]   ;;  %v2092_v46 = vld [vmem:[%s2729_s1 + $0xc8] sm:$0xff]   ;;  %v2097_v50 = vld [vmem:[%s2251_s5 + $0xa4] ss:$20 sps:$4 sm:$0xff]  }
  0x1b   : > { %v2088_v42 = vld [vmem:[%s2251_s5 + $0x25c] ss:$20 sps:$4 sm:$0xff]   ;;  %v2115_v47 = vld [vmem:[%s2729_s1 + $0x108] sm:$0xff]   ;;  %v2096_v52 = vld [vmem:[%s2729_s1 + $0x80] sm:$0xff]  }
  0x1c   : > { %v2085_v43 = vld [vmem:[%s2729_s1 + $0x90] sm:$0xff]   ;;  %v2093_v48 = vld [vmem:[%s2729_s1 + $0x88] sm:$0xff]   ;;  %v2134_v56 = vld [vmem:[%s2729_s1 + $0x100] sm:$0xff]  }
  0x1d   : > { %1739 = vmatpush3.bf16.msra.mxu0 %v2048_v9  ;;  %2026 = vmatpush3.bf16.msra.mxu1 %v2048_v9  ;;  %v2101_v51 = vld [vmem:[%s2251_s5 + $0xc] ss:$20 sps:$4 sm:$0xff]   ;;  %v2105_v57 = vld [vmem:[%s2251_s5 + $0x34] ss:$20 sps:$4 sm:$0xff]   ;;  %v2108_v59 = vld [vmem:[%s2251_s5 + $0x30] ss:$20 sps:$4 sm:$0xff]  }
  0x1e   : > { %1740 = vmatprep.subr.bf16.mxu0 %v2049_v10  ;;  %2019 = vmatprep.subr.bf16.mxu1 %v2049_v10  ;;  %v2102_v54 = vld [vmem:[%s2251_s5 + $0xa0] ss:$20 sps:$4 sm:$0xff]   ;;  %v2107_v58 = vld [vmem:[%s2251_s5 + $0xc8] ss:$20 sps:$4 sm:$0xff]   ;;  %v2113_v62 = vld [vmem:[%s2251_s5 + $0xf0] ss:$20 sps:$4 sm:$0xff]  }
  0x1f   : > { %v2103_v55 = vld [vmem:[%s2251_s5 + $0xcc] ss:$20 sps:$4 sm:$0xff]   ;;  %v2109_v60 = vld [vmem:[%s2251_s5 + $0xf4] ss:$20 sps:$4 sm:$0xff]   ;;  %v2111_v61 = vld [vmem:[%s2251_s5 + $0x5c] ss:$20 sps:$4 sm:$0xff]  }
  0x20   : > { %v2114_v63 = vld [vmem:[%s2251_s5 + $0x58] ss:$20 sps:$4 sm:$0xff]   ;;  %v2116_v0 = vld [vmem:[%s2251_s5 + $0x11c] ss:$20 sps:$4 sm:$0xff]   ;;  %v2121_v3 = vld [vmem:[%s2251_s5 + $0x80] ss:$20 sps:$4 sm:$0xff]  }
  0x21   : > { %1741 = vmatpush3.bf16.msra.mxu0 %v2050_v13  ;;  %2027 = vmatpush3.bf16.msra.mxu1 %v2050_v13  ;;  %v2118_v1 = vld [vmem:[%s2251_s5 + $0x84] ss:$20 sps:$4 sm:$0xff]   ;;  %v2124_v5 = vld [vmem:[%s2251_s5 + $0xac] ss:$20 sps:$4 sm:$0xff]   ;;  %v2127_v7 = vld [vmem:[%s2251_s5 + $0xa8] ss:$20 sps:$4 sm:$0xff]  }
  0x22   : > { %1742 = vmatprep.subr.bf16.mxu0 %v2051_v14  ;;  %2020 = vmatprep.subr.bf16.mxu1 %v2051_v14  ;;  %v2120_v2 = vld [vmem:[%s2251_s5 + $0x118] ss:$20 sps:$4 sm:$0xff]   ;;  %v2126_v6 = vld [vmem:[%s2251_s5 + $0x140] ss:$20 sps:$4 sm:$0xff]   ;;  %v2132_v10 = vld [vmem:[%s2251_s5 + $0x168] ss:$20 sps:$4 sm:$0xff]  }
  0x23   : > { %v2122_v4 = vld [vmem:[%s2251_s5 + $0x144] ss:$20 sps:$4 sm:$0xff]   ;;  %v2128_v8 = vld [vmem:[%s2251_s5 + $0x16c] ss:$20 sps:$4 sm:$0xff]   ;;  %v2130_v9 = vld [vmem:[%s2251_s5 + $0xd4] ss:$20 sps:$4 sm:$0xff]  }
  0x24   : > { %v2133_v11 = vld [vmem:[%s2251_s5 + $0xd0] ss:$20 sps:$4 sm:$0xff]   ;;  %v2135_v12 = vld [vmem:[%s2251_s5 + $0x194] ss:$20 sps:$4 sm:$0xff]  }
  0x25   : > { %1743 = vmatpush3.bf16.msra.mxu0 %v2052_v15  ;;  %2028 = vmatpush3.bf16.msra.mxu1 %v2052_v15  ;;  %v2137_v13 = vld [vmem:[%s2251_s5 + $0xfc] ss:$20 sps:$4 sm:$0xff]   ;;  %v2140_v15 = vld [vmem:[%s2251_s5 + $0xf8] ss:$20 sps:$4 sm:$0xff]  }
  0x26   : > { %1744 = vmatprep.subr.bf16.mxu0 %v2053_v16  ;;  %2021 = vmatprep.subr.bf16.mxu1 %v2053_v16  ;;  %v2139_v14 = vld [vmem:[%s2251_s5 + $0x190] ss:$20 sps:$4 sm:$0xff]  }
  0x27   : > { %v2141_v16 = vld [vmem:[%s2251_s5 + $0x1bc] ss:$20 sps:$4 sm:$0xff]  }
  0x29   : > { %1745 = vmatpush3.bf16.msra.mxu0 %v2054_v17  ;;  %2029 = vmatpush3.bf16.msra.mxu1 %v2054_v17  ;;  %v2143_v17 = vld [vmem:[%s2251_s5 + $0x124] ss:$20 sps:$4 sm:$0xff]  }
  0x2a   : > { %1842 = vmatprep.subr.bf16.mxu1 %v2061_v18  ;;  %1974 = vmatprep.subr.bf16.mxu0 %v2064_v19  ;;  %v2145_v18 = vld [vmem:[%s2251_s5 + $0x1b8] ss:$20 sps:$4 sm:$0xff]  }
  0x2c   : > { %1017 = vmatmul.mubr.bf16.vlgmr.msra.gmra.mxu0 %v2055_v20  ;;  %1113 = vmatmul.mubr.bf16.vlgmr.msra.gmra.mxu1 %v2058_v21  ;;  %v2147_v20 = vld [vmem:[%s2251_s5 + $0x14c] ss:$20 sps:$4 sm:$0xff]   ;;  %v2149_v21 = vld [vmem:[%s2251_s5 + $0x10] ss:$20 sps:$4 sm:$0xff]  }
  0x2d   : > { %1843 = vmatpush3.bf16.msra.mxu1 %v2062_v22  ;;  %1975 = vmatpush3.bf16.msra.mxu0 %v2064_v19  ;;  %v2146_v19 = vld [vmem:[%s2251_s5 + $0x120] ss:$20 sps:$4 sm:$0xff]   ;;  %v2150_v22 = vld [vmem:[%s2251_s5 + $0x148] ss:$20 sps:$4 sm:$0xff]  }
  0x2e   : > { %1844 = vmatprep.subr.bf16.mxu1 %v2063_v23  ;;  %1024 = vmatprep.mubr.bf16.mxu0 %v2066_v24  ;;  %v2151_v23 = vld [vmem:[%s2251_s5 + $0x38] ss:$20 sps:$4 sm:$0xff]   ;;  %v2152_v24 = vld [vmem:[%s2251_s5 + $0x174] ss:$20 sps:$4 sm:$0xff]  }
  0x2f   : > { %1120 = vmatprep.mubr.bf16.mxu1 %v2068_v25  ;;  %1976 = vmatprep.subr.bf16.mxu0 %v2095_v35  ;;  %v2154_v25 = vld [vmem:[%s2251_s5 + $0x60] ss:$20 sps:$4 sm:$0xff]  }
  0x31   : > { %1845 = vmatpush3.bf16.msra.mxu1 %v2065_v26  ;;  %1977 = vmatpush3.bf16.msra.mxu0 %v2095_v35  ;;  %v2155_v26 = vld [vmem:[%s2251_s5 + $0x170] ss:$20 sps:$4 sm:$0xff]   ;;  %v2166_v35 = vld [vmem:[%s2251_s5 + $0x128] ss:$20 sps:$4 sm:$0xff]  }
  0x32   : > { %1846 = vmatprep.subr.bf16.mxu1 %v2072_v28  ;;  %1978 = vmatprep.subr.bf16.mxu0 %v2115_v47  ;;  %v2157_v28 = vld [vmem:[%s2251_s5 + $0x19c] ss:$20 sps:$4 sm:$0xff]  }
  0x34   : > { %1025 = vmatmul.mubr.bf16.gmra.mxu0 %v2070_v27  ;;  %1121 = vmatmul.mubr.bf16.gmra.mxu1 %v2071_v29  ;;  %v2156_v27 = vld [vmem:[%s2251_s5 + $0x88] ss:$20 sps:$4 sm:$0xff]   ;;  %v2159_v29 = vld [vmem:[%s2251_s5 + $0xb0] ss:$20 sps:$4 sm:$0xff]  }
  0x35   : > { %1847 = vmatpush3.bf16.msra.mxu1 %v2073_v30  ;;  %1032 = vmatprep.mubr.bf16.mxu0 %v2076_v32  ;;  %v2160_v30 = vld [vmem:[%s2251_s5 + $0x198] ss:$20 sps:$4 sm:$0xff]  }
  0x36   : > { %1848 = vmatprep.subr.bf16.mxu1 %v2074_v31  ;;  %1128 = vmatprep.mubr.bf16.mxu1 %v2078_v33  ;;  %v2161_v31 = vld [vmem:[%s2251_s5 + $0xd8] ss:$20 sps:$4 sm:$0xff]   ;;  %v2164_v33 = vld [vmem:[%s2251_s5 + $0x100] ss:$20 sps:$4 sm:$0xff]  }
  0x37   : > { %1979 = vmatpush3.bf16.msra.mxu0 %v2115_v47  ;;  %v2162_v32 = vld [vmem:[%s2251_s5 + $0x1c4] ss:$20 sps:$4 sm:$0xff]  }
  0x38   : > { %1980 = vmatprep.subr.bf16.mxu0 %v2134_v56  ;;  %v2181_v47 = vld [vmem:[%s2251_s5 + $0x218] ss:$20 sps:$4 sm:$0xff]  }
  0x39   : > { %1849 = vmatpush3.bf16.msra.mxu1 %v2075_v34  ;;  %v2165_v34 = vld [vmem:[%s2251_s5 + $0x1c0] ss:$20 sps:$4 sm:$0xff]  }
  0x3a   : > { %1850 = vmatprep.subr.bf16.mxu1 %v2082_v37  ;;  %v2169_v37 = vld [vmem:[%s2251_s5 + $0x150] ss:$20 sps:$4 sm:$0xff]  }
  0x3b   : > { %1981 = vmatpush3.bf16.msra.mxu0 %v2134_v56 }
  0x3c   : > { %1033 = vmatmul.mubr.bf16.gmra.mxu0 %v2080_v36  ;;  %1129 = vmatmul.mubr.bf16.gmra.mxu1 %v2081_v38  ;;  %v2167_v36 = vld [vmem:[%s2251_s5 + $0x1ec] ss:$20 sps:$4 sm:$0xff]   ;;  %v2170_v38 = vld [vmem:[%s2251_s5 + $0x1e8] ss:$20 sps:$4 sm:$0xff]  }
  0x3d   : > { %1851 = vmatpush3.bf16.msra.mxu1 %v2083_v39  ;;  %1040 = vmatprep.mubr.bf16.mxu0 %v2086_v41  ;;  %v2171_v39 = vld [vmem:[%s2251_s5 + $0x178] ss:$20 sps:$4 sm:$0xff]   ;;  %v2174_v41 = vld [vmem:[%s2251_s5 + $0x1a0] ss:$20 sps:$4 sm:$0xff]  }
  0x3e   : > { %1852 = vmatprep.subr.bf16.mxu1 %v2084_v40  ;;  %1136 = vmatprep.mubr.bf16.mxu1 %v2088_v42  ;;  %v2172_v40 = vld [vmem:[%s2251_s5 + $0x214] ss:$20 sps:$4 sm:$0xff]   ;;  %v2175_v42 = vld [vmem:[%s2251_s5 + $0x210] ss:$20 sps:$4 sm:$0xff]  }
  0x41   : > { %1853 = vmatpush3.bf16.msra.mxu1 %v2085_v43  ;;  %v2176_v43 = vld [vmem:[%s2251_s5 + $0x1c8] ss:$20 sps:$4 sm:$0xff]  }
  0x42   : > { %1854 = vmatprep.subr.bf16.mxu1 %v2092_v46  ;;  %v2180_v46 = vld [vmem:[%s2251_s5 + $0x238] ss:$20 sps:$4 sm:$0xff]  }
  0x44   : > { %1041 = vmatmul.mubr.bf16.gmra.mxu0 %v2090_v44  ;;  %1137 = vmatmul.mubr.bf16.gmra.mxu1 %v2091_v45  ;;  %v2177_v44 = vld [vmem:[%s2251_s5 + $0x23c] ss:$20 sps:$4 sm:$0xff]  }
  0x45   : > { %1855 = vmatpush3.bf16.msra.mxu1 %v2093_v48  ;;  %1048 = vmatprep.mubr.bf16.mxu0 %v2097_v50  ;;  %v2179_v45 = vld [vmem:[%s2251_s5 + $0x1f0] ss:$20 sps:$4 sm:$0xff]   ;;  %v2185_v50 = vld [vmem:[%s2251_s5 + $0x260] ss:$20 sps:$4 sm:$0xff]  }
  0x46   : > { %1856 = vmatprep.subr.bf16.mxu1 %v2094_v49  ;;  %1177 = vmatprep.mubr.bf16.mxu1 %v2101_v51  ;;  %v2182_v48 = vld [vmem:[%s2251_s5 + $0x264] ss:$20 sps:$4 sm:$0xff]   ;;  %v2184_v49 = vld [vmem:[%s2251_s5 + $0x240] ss:$20 sps:$4 sm:$0xff]   ;;  %v2186_v51 = vld [vmem:[%s2251_s5 + $0x268] ss:$20 sps:$4 sm:$0xff]  }
  0x47   : > { %s1595_s5 = sshll.u32 %s2768_s13, 3 }
  0x48   : > { %s2572_s14 = scalar_lea.vmem %s2730_s2, %s1595_s5 }
  0x49   : > { %1857 = vmatpush3.bf16.msra.mxu1 %v2096_v52 }
  0x4c   : > { %1049 = vmatmul.mubr.bf16.gmra.mxu0 %v2102_v54  ;;  %1178 = vmatmul.mubr.bf16.vlgmr.msra.gmra.mxu1 %v2099_v53 }
  0x4d   : > { %1056 = vmatprep.mubr.bf16.mxu0 %v2103_v55  ;;  %1185 = vmatprep.mubr.bf16.mxu1 %v2105_v57 }
  0x54   : > { %1057 = vmatmul.mubr.bf16.gmra.mxu0 %v2107_v58  ;;  %1186 = vmatmul.mubr.bf16.gmra.mxu1 %v2108_v59 }
  0x55   : > { %1064 = vmatprep.mubr.bf16.mxu0 %v2109_v60  ;;  %1193 = vmatprep.mubr.bf16.mxu1 %v2111_v61 }
  0x5c   : > { %1065 = vmatmul.mubr.bf16.gmra.mxu0 %v2113_v62  ;;  %1194 = vmatmul.mubr.bf16.gmra.mxu1 %v2114_v63 }
  0x5d   : > { %1072 = vmatprep.mubr.bf16.mxu0 %v2116_v0  ;;  %1201 = vmatprep.mubr.bf16.mxu1 %v2118_v1 }
  0x64   : > { %1073 = vmatmul.mubr.bf16.gmra.mxu0 %v2120_v2  ;;  %1202 = vmatmul.mubr.bf16.gmra.mxu1 %v2121_v3 }
  0x65   : > { %1080 = vmatprep.mubr.bf16.mxu0 %v2122_v4  ;;  %1209 = vmatprep.mubr.bf16.mxu1 %v2124_v5 }
  0x6c   : > { %1081 = vmatmul.mubr.bf16.gmra.mxu0 %v2126_v6  ;;  %1210 = vmatmul.mubr.bf16.gmra.mxu1 %v2127_v7 }
  0x6d   : > { %1088 = vmatprep.mubr.bf16.mxu0 %v2128_v8  ;;  %1217 = vmatprep.mubr.bf16.mxu1 %v2130_v9 }
  0x74   : > { %1089 = vmatmul.mubr.bf16.gmra.mxu0 %v2132_v10  ;;  %1218 = vmatmul.mubr.bf16.gmra.mxu1 %v2133_v11 }
  0x75   : > { %1096 = vmatprep.mubr.bf16.mxu0 %v2135_v12  ;;  %1225 = vmatprep.mubr.bf16.mxu1 %v2137_v13 }
  0x7c   : > { %1097 = vmatmul.mubr.bf16.gmra.mxu0 %v2139_v14  ;;  %1226 = vmatmul.mubr.bf16.gmra.mxu1 %v2140_v15 }
  0x7d   : > { %1104 = vmatprep.mubr.bf16.mxu0 %v2141_v16  ;;  %1233 = vmatprep.mubr.bf16.mxu1 %v2143_v17 }
  0x84   : > { %1105 = vmatmul.mubr.bf16.gmra.mxu0 %v2145_v18  ;;  %1234 = vmatmul.mubr.bf16.gmra.mxu1 %v2146_v19 }
  0x85   : > { %1241 = vmatprep.mubr.bf16.mxu1 %v2147_v20  ;;  %1982 = vmatprep.mubr.msk.bf16.mxu0 %vm935_vm0, %v2149_v21 }
  0x8c   : > { %1242 = vmatmul.mubr.bf16.gmra.mxu1 %v2150_v22  ;;  %1983 = vmatmul.mubr.msk.bf16.vlgmr.msra.gmra.mxu0 %vm935_vm0, %v2151_v23 }
  0x8d   : > { %1249 = vmatprep.mubr.bf16.mxu1 %v2152_v24  ;;  %1986 = vmatprep.mubr.msk.bf16.mxu0 %vm935_vm0, %v2154_v25 }
  0x94   : > { %1250 = vmatmul.mubr.bf16.gmra.mxu1 %v2155_v26  ;;  %1987 = vmatmul.mubr.msk.bf16.gmra.mxu0 %vm935_vm0, %v2156_v27 }
  0x95   : > { %1257 = vmatprep.mubr.bf16.mxu1 %v2157_v28  ;;  %1990 = vmatprep.mubr.msk.bf16.mxu0 %vm935_vm0, %v2159_v29 }
  0x9c   : > { %1258 = vmatmul.mubr.bf16.gmra.mxu1 %v2160_v30  ;;  %1991 = vmatmul.mubr.msk.bf16.gmra.mxu0 %vm935_vm0, %v2161_v31 }
  0x9d   : > { %1265 = vmatprep.mubr.bf16.mxu1 %v2162_v32  ;;  %1994 = vmatprep.mubr.msk.bf16.mxu0 %vm935_vm0, %v2164_v33 }
  0xa4   : > { %1266 = vmatmul.mubr.bf16.gmra.mxu1 %v2165_v34  ;;  %1995 = vmatmul.mubr.msk.bf16.gmra.mxu0 %vm935_vm0, %v2166_v35 }
  0xa5   : > { %1273 = vmatprep.mubr.bf16.mxu1 %v2167_v36  ;;  %1998 = vmatprep.mubr.msk.bf16.mxu0 %vm935_vm0, %v2169_v37 }
  0xac   : > { %1274 = vmatmul.mubr.bf16.gmra.mxu1 %v2170_v38  ;;  %1999 = vmatmul.mubr.msk.bf16.gmra.mxu0 %vm935_vm0, %v2171_v39 }
  0xad   : > { %1281 = vmatprep.mubr.bf16.mxu1 %v2172_v40  ;;  %2002 = vmatprep.mubr.msk.bf16.mxu0 %vm935_vm0, %v2174_v41 }
  0xb4   : > { %1282 = vmatmul.mubr.bf16.gmra.mxu1 %v2175_v42  ;;  %2003 = vmatmul.mubr.msk.bf16.gmra.mxu0 %vm935_vm0, %v2176_v43 }
  0xb5   : > { %1289 = vmatprep.mubr.bf16.mxu1 %v2177_v44  ;;  %2006 = vmatprep.mubr.msk.bf16.mxu0 %vm935_vm0, %v2179_v45 }
  0xbc   : > { %1290 = vmatmul.mubr.bf16.gmra.mxu1 %v2180_v46  ;;  %2007 = vmatmul.mubr.msk.bf16.gmra.mxu0 %vm935_vm0, %v2181_v47 }
  0xbd   : > { %1297 = vmatprep.mubr.bf16.mxu1 %v2182_v48  ;;  %2010 = vmatprep.mubr.msk.bf16.mxu0 %vm935_vm0, %v2184_v49 }
  0xc4   : > { %1298 = vmatmul.mubr.bf16.gmra.mxu1 %v2185_v50  ;;  %2011 = vmatmul.mubr.msk.bf16.gmra.mxu0 %vm935_vm0, %v2186_v51 }
  0xec   : > { %v1746_v52 = vpop.f32.mrf.mxu0  ;;  %v1818_v53 = vpop.f32.mrf.mxu1 }
  0xee   : > { %v1747_v54 = vpop.f32.mrf.mxu0  ;;  %v1819_v55 = vpop.f32.mrf.mxu1 }
  0xef   : > { %v2430_v56 = vadd.f32 %v1747_v54, %v1746_v52  ;;  %v2432_v57 = vadd.f32 %v1819_v55, %v1818_v53 }
  0xf0   : > { %v1749_v58 = vpop.f32.mrf.mxu0  ;;  %v1821_v59 = vpop.f32.mrf.mxu1 }
  0xf1   : > { %2731 = vst [vmem:[#allocation2_spill] sm:$0xff] %v2432_v57 }
  0xf2   : > { %v1750_v60 = vpop.f32.mrf.mxu0  ;;  %v1822_v61 = vpop.f32.mrf.mxu1 }
  0xf3   : > { %v2434_v62 = vadd.f32 %v1750_v60, %v1749_v58  ;;  %v2436_v63 = vadd.f32 %v1822_v61, %v1821_v59 }
  0xf4   : > { %v1752_v0 = vpop.f32.mrf.mxu0  ;;  %v1824_v1 = vpop.f32.mrf.mxu1 }
  0xf5   : > { %2732 = vst [vmem:[#allocation3_spill] sm:$0xff] %v2436_v63 }
  0xf6   : > { %v1753_v2 = vpop.f32.mrf.mxu0  ;;  %v1825_v3 = vpop.f32.mrf.mxu1 }
  0xf7   : > { %v2438_v4 = vadd.f32 %v1753_v2, %v1752_v0  ;;  %v2440_v5 = vadd.f32 %v1825_v3, %v1824_v1 }
  0xf8   : > { %v1755_v6 = vpop.f32.mrf.mxu0  ;;  %v1827_v7 = vpop.f32.mrf.mxu1 }
  0xf9   : > { %2733 = vst [vmem:[#allocation4_spill] sm:$0xff] %v2440_v5 }
  0xfa   : > { %v1756_v8 = vpop.f32.mrf.mxu0  ;;  %v1828_v9 = vpop.f32.mrf.mxu1 }
  0xfb   : > { %v2442_v10 = vadd.f32 %v1756_v8, %v1755_v6  ;;  %v2444_v11 = vadd.f32 %v1828_v9, %v1827_v7 }
  0xfc   : > { %v1758_v12 = vpop.f32.mrf.mxu0  ;;  %v1830_v13 = vpop.f32.mrf.mxu1 }
  0xfd   : > { %2734 = vst [vmem:[#allocation5_spill] sm:$0xff] %v2444_v11 }
  0xfe   : > { %v1759_v14 = vpop.f32.mrf.mxu0  ;;  %v1831_v15 = vpop.f32.mrf.mxu1 }
  0xff   : > { %v2446_v16 = vadd.f32 %v1759_v14, %v1758_v12  ;;  %v2448_v17 = vadd.f32 %v1831_v15, %v1830_v13 }
 0x100   : > { %v1761_v18 = vpop.f32.mrf.mxu0  ;;  %v1833_v19 = vpop.f32.mrf.mxu1 }
 0x101   : > { %2735 = vst [vmem:[#allocation6_spill] sm:$0xff] %v2448_v17 }
 0x102   : > { %v1762_v20 = vpop.f32.mrf.mxu0  ;;  %v1834_v21 = vpop.f32.mrf.mxu1 }
 0x103   : > { %v2450_v22 = vadd.f32 %v1762_v20, %v1761_v18  ;;  %v2452_v23 = vadd.f32 %v1834_v21, %v1833_v19 }
 0x104   : > { %v1764_v24 = vpop.f32.mrf.mxu0  ;;  %v1836_v25 = vpop.f32.mrf.mxu1 }
 0x105   : > { %2736 = vst [vmem:[#allocation7_spill] sm:$0xff] %v2452_v23 }
 0x106   : > { %v1765_v26 = vpop.f32.mrf.mxu0  ;;  %v1837_v27 = vpop.f32.mrf.mxu1 }
 0x107   : > { %v2454_v28 = vadd.f32 %v1765_v26, %v1764_v24  ;;  %v2456_v29 = vadd.f32 %v1837_v27, %v1836_v25 }
 0x108   : > { %v1767_v30 = vpop.f32.mrf.mxu0  ;;  %v1839_v31 = vpop.f32.mrf.mxu1 }
 0x109   : > { %2737 = vst [vmem:[#allocation8_spill] sm:$0xff] %v2456_v29 }
 0x10a   : > { %v1768_v32 = vpop.f32.mrf.mxu0  ;;  %v1840_v33 = vpop.f32.mrf.mxu1 }
 0x10b   : > { %v2458_v34 = vadd.f32 %v1768_v32, %v1767_v30  ;;  %v2460_v35 = vadd.f32 %v1840_v33, %v1839_v31 }
 0x10c   : > { %v1770_v36 = vpop.f32.mrf.mxu0  ;;  %v2462_v37 = vpop.f32.mrf.mxu1 }
 0x10d   : > { %2738 = vst [vmem:[#allocation9_spill] sm:$0xff] %v2460_v35 }
 0x10e   : > { %v1771_v38 = vpop.f32.mrf.mxu0  ;;  %v2464_v39 = vpop.f32.mrf.mxu1 }
 0x10f   : > { %v2466_v40 = vadd.f32 %v1771_v38, %v1770_v36 }
 0x110   : > { %v1773_v41 = vpop.f32.mrf.mxu0  ;;  %v2468_v42 = vpop.f32.mrf.mxu1 }
 0x112   : > { %v1774_v43 = vpop.f32.mrf.mxu0  ;;  %v2470_v44 = vpop.f32.mrf.mxu1 }
 0x113   : > { %v2472_v45 = vadd.f32 %v1774_v43, %v1773_v41 }
 0x114   : > { %v1776_v46 = vpop.f32.mrf.mxu0  ;;  %v1864_v47 = vpop.f32.mrf.mxu1 }
 0x116   : > { %v1777_v48 = vpop.f32.mrf.mxu0  ;;  %v1865_v49 = vpop.f32.mrf.mxu1 }
 0x117   : > { %v2474_v50 = vadd.f32 %v1777_v48, %v1776_v46  ;;  %v1866_v57 = vadd.f32 %v1865_v49, %v1864_v47  ;;  %v1863_v47 = vadd.f32 %v2470_v44, %v2468_v42 }
 0x118   : > { %v1779_v51 = vpop.f32.mrf.mxu0  ;;  %v1867_v52 = vpop.f32.mrf.mxu1 }
 0x119   : > { %v1183_v44 = vadd.f32 %v1863_v47, %v2434_v62 }
 0x11a   : > { %v1780_v53 = vpop.f32.mrf.mxu0  ;;  %v1868_v54 = vpop.f32.mrf.mxu1 }
 0x11b   : > { %v2476_v55 = vadd.f32 %v1780_v53, %v1779_v51 }
 0x11c   : > { %v1782_v58 = vpop.f32.mrf.mxu0  ;;  %v2478_v59 = vpop.f32.mrf.mxu1 }
 0x11e   : > { %v1783_v60 = vpop.f32.mrf.mxu0  ;;  %v2480_v61 = vpop.f32.mrf.mxu1 }
 0x11f   : > { %v2482_v0 = vadd.f32 %v1783_v60, %v1782_v58 }
 0x120   : > { %v1785_v1 = vpop.f32.mrf.mxu0  ;;  %v2484_v2 = vpop.f32.mrf.mxu1 }
 0x122   : > { %v1786_v3 = vpop.f32.mrf.mxu0  ;;  %v2486_v6 = vpop.f32.mrf.mxu1 }
 0x123   : > { %v2488_v7 = vadd.f32 %v1786_v3, %v1785_v1 }
 0x124   : > { %v2490_v8 = vpop.f32.mrf.mxu0  ;;  %v1876_v9 = vpop.f32.mrf.mxu1 }
 0x126   : > { %v2492_v12 = vpop.f32.mrf.mxu0  ;;  %v1877_v13 = vpop.f32.mrf.mxu1 }
 0x128   : > { %v2494_v14 = vpop.f32.mrf.mxu0  ;;  %v1879_v15 = vpop.f32.mrf.mxu1 }
 0x12a   : > { %v2496_v18 = vpop.f32.mrf.mxu0  ;;  %v1880_v19 = vpop.f32.mrf.mxu1 }
 0x12c   : > { %v2498_v20 = vpop.f32.mrf.mxu0  ;;  %v2500_v21 = vpop.f32.mrf.mxu1 }
 0x12e   : > { %v2502_v24 = vpop.f32.mrf.mxu0  ;;  %v2504_v25 = vpop.f32.mrf.mxu1 }
 0x130   : > { %v2506_v26 = vpop.f32.mrf.mxu0  ;;  %v2508_v27 = vpop.f32.mrf.mxu1 }
 0x131   : > { %2739 = vst [vmem:[#allocation10_spill] sm:$0xff] %v2506_v26 }
 0x132   : > { %v2510_v30 = vpop.f32.mrf.mxu0  ;;  %v2512_v31 = vpop.f32.mrf.mxu1 }
 0x133   : > { %2740 = vst [vmem:[#allocation11_spill] sm:$0xff] %v2510_v30  ;;  %v1869_v30 = vadd.f32 %v1868_v54, %v1867_v52 }
 0x134   : > { %v2514_v32 = vpop.f32.mrf.mxu0  ;;  %v2516_v33 = vpop.f32.mrf.mxu1 }
 0x135   : > { %v1191_v54 = vadd.f32 %v1869_v30, %v2442_v10 }
 0x136   : > { %v2518_v36 = vpop.f32.mrf.mxu0  ;;  %v1889_v38 = vpop.f32.mrf.mxu1 }
 0x138   : > { %v2520_v41 = vpop.f32.mrf.mxu0  ;;  %v2522_v43 = vpop.f32.mrf.mxu1 }
 0x13a   : > { %v2524_v46 = vpop.f32.mrf.mxu0  ;;  %v2526_v48 = vpop.f32.mrf.mxu1 }
 0x13c   : > { %v2528_v51 = vpop.f32.mrf.mxu0  ;;  %v2530_v53 = vpop.f32.mrf.mxu1 }
 0x13d   : > { %2741 = vst [vmem:[#allocation12_spill] sm:$0xff] %v2528_v51 }
 0x13e   : > { %v2532_v58 = vpop.f32.mrf.mxu0  ;;  %v2534_v60 = vpop.f32.mrf.mxu1 }
 0x13f   : > { %2742 = vst [vmem:[#allocation13_spill] sm:$0xff] %v2532_v58 }
 0x140   : > { %v2536_v1 = vpop.f32.mrf.mxu0  ;;  %v2538_v3 = vpop.f32.mrf.mxu1 }
 0x141   : > { %2743 = vst [vmem:[#allocation14_spill] sm:$0xff] %v2536_v1  ;;  %v1860_v1 = vadd.f32 %v2464_v39, %v2462_v37 }
 0x142   : > { %v2540_v35 = vpop.f32.mrf.mxu0  ;;  %v2542_v23 = vpop.f32.mrf.mxu1 }
 0x143   : > { %2744 = vst [vmem:[#allocation15_spill] sm:$0xff] %v2540_v35 }
 0x144   : > { %v2544_v29 = vpop.f32.mrf.mxu0  ;;  %v2546_v17 = vpop.f32.mrf.mxu1 }
 0x145   : > { %2745 = vst [vmem:[#allocation16_spill] sm:$0xff] %v2544_v29  ;;  %v1188_v29 = vadd.f32 %v1866_v57, %v2438_v4  ;;  %v1878_v57 = vadd.f32 %v1877_v13, %v1876_v9 }
 0x146   : > { %v2548_v63 = vpop.f32.mrf.mxu0  ;;  %v2550_v11 = vpop.f32.mrf.mxu1 }
 0x147   : > { %2746 = vst [vmem:[#allocation17_spill] sm:$0xff] %v2548_v63  ;;  %v1204_v30 = vadd.f32 %v1878_v57, %v2454_v28 }
 0x148   : > { %v2552_v5 = vpop.f32.mrf.mxu0  ;;  %v2554_v58 = vpop.f32.mrf.mxu1 }
 0x149   : > { %2747 = vst [vmem:[#allocation18_spill] sm:$0xff] %v2552_v5  ;;  %v1180_v5 = vadd.f32 %v1860_v1, %v2430_v56  ;;  %v1872_v56 = vadd.f32 %v2480_v61, %v2478_v59  ;;  %v1875_v61 = vadd.f32 %v2486_v6, %v2484_v2  ;;  %v1884_v6 = vadd.f32 %v2504_v25, %v2500_v21 }
 0x14a   : > { %v2558_v51 = vpop.f32.mrf.mxu0  ;;  %v2560_v35 = vpop.f32.mrf.mxu1  ;;  %v1887_v25 = vadd.f32 %v2512_v31, %v2508_v27  ;;  %v1790_v31 = vadd.f32 %v2492_v12, %v2490_v8 }
 0x14b   : > { %2748 = vst [vmem:[#allocation19_spill] sm:$0xff] %v2558_v51 }
 0x14c   : > { %v2564_v26 = vpop.f32.mrf.mxu1  ;;  %v1984_v63 = vpop.f32.mrf.mxu0 }
 0x14d   : > { %v1349_v49 = vadd.f32 %v1984_v63, %v1188_v29 }
 0x14e   : > { %v2574_v37 = vpop.f32.mrf.mxu1  ;;  %v1340_v39 = vpop.f32.mrf.mxu0 }
 0x14f   : > { %v1469_v4 = vmax.f32 %v1349_v49, 0.0  ;;  %v1341_v52 = vadd.f32 %v1340_v39, %v1180_v5  ;;  %v1881_v5 = vadd.f32 %v1880_v19, %v1879_v15  ;;  %v1196_v39 = vadd.f32 %v1872_v56, %v2446_v16 }
 0x150   : > { %v2577_v51 = vpop.f32.mrf.mxu1  ;;  %v1985_v63 = vpop.f32.mrf.mxu0  ;;  %v1199_v56 = vadd.f32 %v1875_v61, %v2450_v22 }
 0x151   : > { %1501 = vst.msk [vmem:[%s2572_s14 + $0x10] sm:$0xff] %vm935_vm0, %v1469_v4  ;;  %v1467_v29 = vmax.f32 %v1341_v52, 0.0  ;;  %v1352_v42 = vadd.f32 %v1985_v63, %v1191_v54  ;;  %v1890_v4 = vadd.f32 %v1889_v38, %v2516_v33  ;;  %v1207_v52 = vadd.f32 %v1881_v5, %v2458_v34 }
 0x152   : > { %v2584_v1 = vpop.f32.mrf.mxu1  ;;  %v1343_v9 = vpop.f32.mrf.mxu0 }
 0x153   : > { %1499 = vst.msk [vmem:[%s2572_s14] sm:$0xff] %vm935_vm0, %v1467_v29  ;;  %v1470_v10 = vmax.f32 %v1352_v42, 0.0  ;;  %v1344_v13 = vadd.f32 %v1343_v9, %v1183_v44  ;;  %v1893_v29 = vadd.f32 %v2526_v48, %v2522_v43  ;;  %v1220_v44 = vadd.f32 %v1890_v4, %v2474_v50 }
 0x154   : > { %v2589_v49 = vpop.f32.mrf.mxu1  ;;  %v1988_v59 = vpop.f32.mrf.mxu0 }
 0x155   : > { %1502 = vst.msk [vmem:[%s2572_s14 + $0x18] sm:$0xff] %vm935_vm0, %v1470_v10  ;;  %v1468_v62 = vmax.f32 %v1344_v13, 0.0  ;;  %v1365_v47 = vadd.f32 %v1988_v59, %v1204_v30  ;;  %v1212_v10 = vadd.f32 %v1884_v6, %v2466_v40  ;;  %v1902_v13 = vadd.f32 %v2550_v11, %v2546_v17 }
 0x156   : > { %v1913_v15 = vpop.f32.mrf.mxu1  ;;  %v1356_v19 = vpop.f32.mrf.mxu0  ;;  %v1223_v27 = vadd.f32 %v1893_v29, %v2476_v55  ;;  %v1896_v40 = vadd.f32 %v2534_v60, %v2530_v53  ;;  %v1905_v55 = vadd.f32 %v2560_v35, %v2554_v58  ;;  %v1793_v53 = vadd.f32 %v2496_v18, %v2494_v14 }
 0x157   : > { %1500 = vst.msk [vmem:[%s2572_s14 + $0x8] sm:$0xff] %vm935_vm0, %v1468_v62  ;;  %v1473_v28 = vmax.f32 %v1365_v47, 0.0  ;;  %v1357_v57 = vadd.f32 %v1356_v19, %v1196_v39  ;;  %v1215_v62 = vadd.f32 %v1887_v25, %v2472_v45  ;;  %v1236_v19 = vadd.f32 %v1902_v13, %v1790_v31  ;;  %v2751_v13 = vld [vmem:[#allocation16_spill] sm:$0xff] }
 0x158   : > { %v2600_v54 = vpop.f32.mrf.mxu1  ;;  %v1989_v2 = vpop.f32.mrf.mxu0  ;;  %v1899_v45 = vadd.f32 %v2542_v23, %v2538_v3  ;;  %v1228_v35 = vadd.f32 %v1896_v40, %v2482_v0  ;;  %v1239_v6 = vadd.f32 %v1905_v55, %v1793_v53  ;;  %v1802_v23 = vadd.f32 %v2518_v36, %v2514_v32 }
 0x159   : > { %1505 = vst.msk [vmem:[%s2572_s14 + $0x30] sm:$0xff] %vm935_vm0, %v1473_v28  ;;  %v1471_v16 = vmax.f32 %v1357_v57, 0.0  ;;  %v1368_v63 = vadd.f32 %v1989_v2, %v1207_v52  ;;  %v1914_v2 = vadd.f32 %v1913_v15, %v2589_v49  ;;  %v1796_v15 = vadd.f32 %v2502_v24, %v2498_v20 }
 0x15a   : > { %v1916_v33 = vpop.f32.mrf.mxu1  ;;  %v1359_v38 = vpop.f32.mrf.mxu0  ;;  %v1231_v49 = vadd.f32 %v1899_v45, %v2488_v7  ;;  %v1911_v7 = vadd.f32 %v2584_v1, %v2577_v51  ;;  %v2752_v51 = vld [vmem:[#allocation17_spill] sm:$0xff] }
 0x15b   : > { %1503 = vst.msk [vmem:[%s2572_s14 + $0x20] sm:$0xff] %vm935_vm0, %v1471_v16  ;;  %v1474_v34 = vmax.f32 %v1368_v63, 0.0  ;;  %v1360_v42 = vadd.f32 %v1359_v38, %v1199_v56  ;;  %v1908_v63 = vadd.f32 %v2574_v37, %v2564_v26  ;;  %v1252_v26 = vadd.f32 %v1914_v2, %v1802_v23  ;;  %v2758_v2 = vld [vmem:[#allocation15_spill] sm:$0xff] }
 0x15c   : > { %v2612_v9 = vpop.f32.mrf.mxu1  ;;  %v1992_v21 = vpop.f32.mrf.mxu0  ;;  %v1805_v37 = vadd.f32 %v2524_v46, %v2520_v41  ;;  %v1814_v1 = vadd.f32 %v2752_v51, %v2751_v13 }
 0x15d   : > { %1506 = vst.msk [vmem:[%s2572_s14 + $0x38] sm:$0xff] %vm935_vm0, %v1474_v34  ;;  %v1472_v22 = vmax.f32 %v1360_v42, 0.0  ;;  %v1381_v5 = vadd.f32 %v1992_v21, %v1220_v44  ;;  %v1917_v34 = vadd.f32 %v1916_v33, %v2600_v54  ;;  %v1244_v54 = vadd.f32 %v1908_v63, %v1796_v15  ;;  %v2749_v33 = vld [vmem:[#allocation10_spill] sm:$0xff]  ;;  %v2750_v21 = vld [vmem:[#allocation11_spill] sm:$0xff] }
 0x15e   : > { %v2619_v43 = vpop.f32.mrf.mxu1  ;;  %v1372_v48 = vpop.f32.mrf.mxu0  ;;  %v1799_v25 = vadd.f32 %v2750_v21, %v2749_v33 }
 0x15f   : > { %1504 = vst.msk [vmem:[%s2572_s14 + $0x28] sm:$0xff] %vm935_vm0, %v1472_v22  ;;  %v1477_v50 = vmax.f32 %v1381_v5, 0.0  ;;  %v1373_v30 = vadd.f32 %v1372_v48, %v1212_v10  ;;  %v1255_v48 = vadd.f32 %v1917_v34, %v1805_v37 }
 0x160   : > { %v2628_v59 = vpop.f32.mrf.mxu1  ;;  %v1993_v61 = vpop.f32.mrf.mxu0  ;;  %v1247_v40 = vadd.f32 %v1911_v7, %v1799_v25 }
 0x161   : > { %1509 = vst.msk [vmem:[%s2572_s14 + $0x50] sm:$0xff] %vm935_vm0, %v1477_v50  ;;  %v1475_v11 = vmax.f32 %v1373_v30, 0.0  ;;  %v1384_v17 = vadd.f32 %v1993_v61, %v1223_v27  ;;  %v1920_v27 = vadd.f32 %v2619_v43, %v2612_v9  ;;  %v2756_v9 = vld [vmem:[#allocation19_spill] sm:$0xff] }
 0x162   : > { %v2635_v47 = vpop.f32.mrf.mxu1  ;;  %v1375_v39 = vpop.f32.mrf.mxu0 }
 0x163   : > { %1507 = vst.msk [vmem:[%s2572_s14 + $0x40] sm:$0xff] %vm935_vm0, %v1475_v11  ;;  %v1478_v8 = vmax.f32 %v1384_v17, 0.0  ;;  %v1376_v12 = vadd.f32 %v1375_v39, %v1215_v62  ;;  %v2753_v11 = vld [vmem:[#allocation12_spill] sm:$0xff]  ;;  %v2754_v17 = vld [vmem:[#allocation13_spill] sm:$0xff] }
 0x164   : > { %v1924_v60 = vpop.f32.mrf.mxu1  ;;  %v1996_v4 = vpop.f32.mrf.mxu0  ;;  %v1808_v62 = vadd.f32 %v2754_v17, %v2753_v11 }
 0x165   : > { %1510 = vst.msk [vmem:[%s2572_s14 + $0x58] sm:$0xff] %vm935_vm0, %v1478_v8  ;;  %v1476_v28 = vmax.f32 %v1376_v12, 0.0  ;;  %v1397_v57 = vadd.f32 %v1996_v4, %v1236_v19 }
 0x166   : > { %v1925_v58 = vpop.f32.mrf.mxu1  ;;  %v1388_v52 = vpop.f32.mrf.mxu0 }
 0x167   : > { %1508 = vst.msk [vmem:[%s2572_s14 + $0x48] sm:$0xff] %vm935_vm0, %v1476_v28  ;;  %v1481_v14 = vmax.f32 %v1397_v57, 0.0  ;;  %v1389_v18 = vadd.f32 %v1388_v52, %v1228_v35  ;;  %v1926_v10 = vadd.f32 %v1925_v58, %v1924_v60  ;;  %v2755_v60 = vld [vmem:[#allocation18_spill] sm:$0xff]  ;;  %v1923_v28 = vadd.f32 %v2635_v47, %v2628_v59 }
 0x168   : > { %v1927_v3 = vpop.f32.mrf.mxu1  ;;  %v1997_v16 = vpop.f32.mrf.mxu0  ;;  %v1817_v43 = vadd.f32 %v2756_v9, %v2755_v60  ;;  %v1260_v58 = vadd.f32 %v1920_v27, %v1808_v62  ;;  %v2757_v52 = vld [vmem:[#allocation14_spill] sm:$0xff] }
 0x169   : > { %1513 = vst.msk [vmem:[%s2572_s14 + $0x70] sm:$0xff] %vm935_vm0, %v1481_v14  ;;  %v1479_v0 = vmax.f32 %v1389_v18, 0.0  ;;  %v1400_v56 = vadd.f32 %v1997_v16, %v1239_v6  ;;  %v1268_v53 = vadd.f32 %v1926_v10, %v1814_v1  ;;  %v1811_v14 = vadd.f32 %v2758_v2, %v2757_v52  ;;  %v2761_v10 = vld [vmem:[#allocation5_spill] sm:$0xff] }
 0x16a   : > { %v1928_v38 = vpop.f32.mrf.mxu1  ;;  %v1391_v29 = vpop.f32.mrf.mxu0 }
 0x16b   : > { %1511 = vst.msk [vmem:[%s2572_s14 + $0x60] sm:$0xff] %vm935_vm0, %v1479_v0  ;;  %v1482_v32 = vmax.f32 %v1400_v56, 0.0  ;;  %v1392_v36 = vadd.f32 %v1391_v29, %v1231_v49  ;;  %v1929_v8 = vadd.f32 %v1928_v38, %v1927_v3  ;;  %v1263_v15 = vadd.f32 %v1923_v28, %v1811_v14 }
 0x16c   : > { %v1930_v42 = vpop.f32.mrf.mxu1  ;;  %v2000_v44 = vpop.f32.mrf.mxu0 }
 0x16d   : > { %1514 = vst.msk [vmem:[%s2572_s14 + $0x78] sm:$0xff] %vm935_vm0, %v1482_v32  ;;  %v1480_v20 = vmax.f32 %v1392_v36, 0.0  ;;  %v1413_v24 = vadd.f32 %v2000_v44, %v1252_v26  ;;  %v1271_v63 = vadd.f32 %v1929_v8, %v1817_v43  ;;  %v2759_v26 = vld [vmem:[#allocation4_spill] sm:$0xff] }
 0x16e   : > { %v1931_v22 = vpop.f32.mrf.mxu1  ;;  %v1404_v5 = vpop.f32.mrf.mxu0 }
 0x16f   : > { %1512 = vst.msk [vmem:[%s2572_s14 + $0x68] sm:$0xff] %vm935_vm0, %v1480_v20  ;;  %v1485_v41 = vmax.f32 %v1413_v24, 0.0  ;;  %v1405_v46 = vadd.f32 %v1404_v5, %v1244_v54  ;;  %v1932_v47 = vadd.f32 %v1931_v22, %v1930_v42  ;;  %v2760_v54 = vld [vmem:[#allocation2_spill] sm:$0xff] }
 0x170   : > { %v1933_v50 = vpop.f32.mrf.mxu1  ;;  %v2001_v30 = vpop.f32.mrf.mxu0 }
 0x171   : > { %1517 = vst.msk [vmem:[%s2572_s14 + $0x90] sm:$0xff] %vm935_vm0, %v1485_v41  ;;  %v1483_v31 = vmax.f32 %v1405_v46, 0.0  ;;  %v1416_v61 = vadd.f32 %v2001_v30, %v1255_v48  ;;  %v1276_v33 = vadd.f32 %v1932_v47, %v2760_v54 }
 0x172   : > { %v1934_v39 = vpop.f32.mrf.mxu1  ;;  %v1407_v55 = vpop.f32.mrf.mxu0 }
 0x173   : > { %1515 = vst.msk [vmem:[%s2572_s14 + $0x80] sm:$0xff] %vm935_vm0, %v1483_v31  ;;  %v1486_v12 = vmax.f32 %v1416_v61, 0.0  ;;  %v1408_v19 = vadd.f32 %v1407_v55, %v1247_v40  ;;  %v1935_v20 = vadd.f32 %v1934_v39, %v1933_v50  ;;  %v2762_v50 = vld [vmem:[#allocation3_spill] sm:$0xff]  ;;  %v2763_v55 = vld [vmem:[#allocation6_spill] sm:$0xff] }
 0x174   : > { %v1936_v4 = vpop.f32.mrf.mxu1  ;;  %v2004_v45 = vpop.f32.mrf.mxu0 }
 0x175   : > { %1518 = vst.msk [vmem:[%s2572_s14 + $0x98] sm:$0xff] %vm935_vm0, %v1486_v12  ;;  %v1484_v57 = vmax.f32 %v1408_v19, 0.0  ;;  %v1429_v35 = vadd.f32 %v2004_v45, %v1268_v53  ;;  %v1279_v30 = vadd.f32 %v1935_v20, %v2762_v50 }
 0x176   : > { %v1937_v18 = vpop.f32.mrf.mxu1  ;;  %v1420_v6 = vpop.f32.mrf.mxu0 }
 0x177   : > { %1516 = vst.msk [vmem:[%s2572_s14 + $0x88] sm:$0xff] %vm935_vm0, %v1484_v57  ;;  %v1489_v23 = vmax.f32 %v1429_v35, 0.0  ;;  %v1938_v3 = vadd.f32 %v1937_v18, %v1936_v4  ;;  %v1421_v16 = vadd.f32 %v1420_v6, %v1260_v58  ;;  %v2764_v4 = vld [vmem:[#allocation8_spill] sm:$0xff]  ;;  %v2765_v57 = vld [vmem:[#allocation7_spill] sm:$0xff] }
 0x178   : > { %v1939_v0 = vpop.f32.mrf.mxu1  ;;  %v2005_v59 = vpop.f32.mrf.mxu0 }
 0x179   : > { %1521 = vst.msk [vmem:[%s2572_s14 + $0xb0] sm:$0xff] %vm935_vm0, %v1489_v23  ;;  %v1487_v56 = vmax.f32 %v1421_v16, 0.0  ;;  %v1432_v49 = vadd.f32 %v2005_v59, %v1271_v63  ;;  %v1284_v37 = vadd.f32 %v1938_v3, %v2759_v26  ;;  %v2766_v23 = vld [vmem:[#allocation9_spill] sm:$0xff] }
 0x17a   : > { %v1940_v38 = vpop.f32.mrf.mxu1  ;;  %v1423_v29 = vpop.f32.mrf.mxu0 }
 0x17b   : > { %1519 = vst.msk [vmem:[%s2572_s14 + $0xa0] sm:$0xff] %vm935_vm0, %v1487_v56  ;;  %v1490_v34 = vmax.f32 %v1432_v49, 0.0  ;;  %v1941_v32 = vadd.f32 %v1940_v38, %v1939_v0  ;;  %v1424_v36 = vadd.f32 %v1423_v29, %v1263_v15 }
 0x17c   : > { %v1942_v44 = vpop.f32.mrf.mxu1  ;;  %v2008_v7 = vpop.f32.mrf.mxu0 }
 0x17d   : > { %1522 = vst.msk [vmem:[%s2572_s14 + $0xb8] sm:$0xff] %vm935_vm0, %v1490_v34  ;;  %v1488_v42 = vmax.f32 %v1424_v36, 0.0  ;;  %v1445_v24 = vadd.f32 %v2008_v7, %v1284_v37  ;;  %v1287_v41 = vadd.f32 %v1941_v32, %v2761_v10 }
 0x17e   : > { %v1943_v21 = vpop.f32.mrf.mxu1  ;;  %v1436_v25 = vpop.f32.mrf.mxu0 }
 0x17f   : > { %1520 = vst.msk [vmem:[%s2572_s14 + $0xa8] sm:$0xff] %vm935_vm0, %v1488_v42  ;;  %v1493_v22 = vmax.f32 %v1445_v24, 0.0  ;;  %v1437_v5 = vadd.f32 %v1436_v25, %v1276_v33  ;;  %v1944_v13 = vadd.f32 %v1943_v21, %v1942_v44 }
 0x180   : > { %v1945_v46 = vpop.f32.mrf.mxu1  ;;  %v2009_v48 = vpop.f32.mrf.mxu0 }
 0x181   : > { %1525 = vst.msk [vmem:[%s2572_s14 + $0xd0] sm:$0xff] %vm935_vm0, %v1493_v22  ;;  %v1491_v51 = vmax.f32 %v1437_v5, 0.0  ;;  %v1448_v1 = vadd.f32 %v2009_v48, %v1287_v41  ;;  %v1292_v8 = vadd.f32 %v1944_v13, %v2763_v55 }
 0x182   : > { %v1946_v27 = vpop.f32.mrf.mxu1  ;;  %v1439_v31 = vpop.f32.mrf.mxu0 }
 0x183   : > { %1523 = vst.msk [vmem:[%s2572_s14 + $0xc0] sm:$0xff] %vm935_vm0, %v1491_v51  ;;  %v1494_v61 = vmax.f32 %v1448_v1, 0.0  ;;  %v1440_v40 = vadd.f32 %v1439_v31, %v1279_v30  ;;  %v1947_v62 = vadd.f32 %v1946_v27, %v1945_v46 }
 0x184   : > { %v1948_v11 = vpop.f32.mrf.mxu1  ;;  %v2012_v17 = vpop.f32.mrf.mxu0 }
 0x185   : > { %1526 = vst.msk [vmem:[%s2572_s14 + $0xd8] sm:$0xff] %vm935_vm0, %v1494_v61  ;;  %v1492_v39 = vmax.f32 %v1440_v40, 0.0  ;;  %v1295_v35 = vadd.f32 %v1947_v62, %v2765_v57 }
 0x186   : > { %v1949_v12 = vpop.f32.mrf.mxu1  ;;  %v1452_v19 = vpop.f32.mrf.mxu0 }
 0x187   : > { %1524 = vst.msk [vmem:[%s2572_s14 + $0xc8] sm:$0xff] %vm935_vm0, %v1492_v39  ;;  %v1950_v53 = vadd.f32 %v1949_v12, %v1948_v11  ;;  %v1453_v60 = vadd.f32 %v1452_v19, %v1292_v8 }
 0x188   : > { %v1951_v9 = vpop.f32.mrf.mxu1  ;;  %v2013_v43 = vpop.f32.mrf.mxu0 }
 0x189   : > { %v1300_v45 = vadd.f32 %v1950_v53, %v2764_v4  ;;  %v1495_v28 = vmax.f32 %v1453_v60, 0.0 }
 0x18a   : > { %v1952_v58 = vpop.f32.mrf.mxu1  ;;  %v1455_v52 = vpop.f32.mrf.mxu0 }
 0x18b   : > { %v1461_v2 = vadd.f32 %v2012_v17, %v1300_v45  ;;  %1527 = vst.msk [vmem:[%s2572_s14 + $0xe0] sm:$0xff] %vm935_vm0, %v1495_v28  ;;  %v1953_v14 = vadd.f32 %v1952_v58, %v1951_v9  ;;  %v1456_v18 = vadd.f32 %v1455_v52, %v1295_v35 }
 0x18d   : > { %v1497_v6 = vmax.f32 %v1461_v2, 0.0  ;;  %v1303_v3 = vadd.f32 %v1953_v14, %v2766_v23  ;;  %v1496_v16 = vmax.f32 %v1456_v18, 0.0 }
 0x18f   : > { %1529 = vst.msk [vmem:[%s2572_s14 + $0xf0] sm:$0xff] %vm935_vm0, %v1497_v6  ;;  %v1464_v63 = vadd.f32 %v2013_v43, %v1303_v3  ;;  %1528 = vst.msk [vmem:[%s2572_s14 + $0xe8] sm:$0xff] %vm935_vm0, %v1496_v16 }
 0x191   : > { %v1498_v0 = vmax.f32 %v1464_v63, 0.0 }
 0x193   : > { %1530 = vst.msk [vmem:[%s2572_s14 + $0xf8] sm:$0xff] %vm935_vm0, %v1498_v0 }
 0x194 PF: > { %s12_s9 = sadd.s32 1, %s2193_s9  }
 0x195   : > { %p9_p4 = scmp.ge.s32.totalorder %s12_s9, 4  }
 0x197   :  { %11 = sbr.rel (!%p9_p4) target bundleno = 1 (0x1), region = 58 }

</bundles_post_ra>
